<compile_context>
chip_gen: v7x
topology: tpu7x:2x2x1
jax: 0.10.0
libtpu: 0.0.40
codegen_flags: <defaults>
</compile_context>

<pallas_src>
import functools

import jax
import jax.numpy as jnp
from jax import lax
from jax.experimental import pallas as pl
from jax.experimental.pallas import tpu as pltpu


def _topk_mask_kernel(x_ref, o_ref, *, k):
    """Keep the top-k activations per row of the tile, zero the rest."""
    x = x_ref[...]                      # read the tile once, original dtype
    tm, n = x.shape
    cdt = x.dtype if jnp.issubdtype(x.dtype, jnp.floating) else jnp.float32
    neg_inf = jnp.array(-jnp.inf, cdt)
    col = lax.broadcasted_iota(jnp.int32, (tm, n), 1)   # hoisted out of the loop

    work0 = x.astype(cdt)               # mutable working copy (picked -> -inf)
    out0 = jnp.zeros_like(x)            # accumulated output

    def body(_, carry):
        work, out = carry
        row_max = jnp.max(work, axis=1, keepdims=True)          # XLU reduce
        is_max = work == row_max
        cand = jnp.where(is_max, col, jnp.int32(n))
        min_idx = jnp.min(cand, axis=1, keepdims=True)           # XLU reduce
        newly = col == min_idx          # exactly one lane per row (if any left)
        out = jnp.where(newly, x, out)
        work = jnp.where(newly, neg_inf, work)
        return work, out

    # k is a static Python int: fully unroll so the scheduler can overlap the
    # VPU selects/compares of step i+1 with the XLU reduce latency of step i.
    _, out = lax.fori_loop(0, k, body, (work0, out0), unroll=True)
    o_ref[...] = out


def _pick_row_tile(m, n, itemsize):
    """Pick the largest row tile that keeps the VMEM footprint modest."""
    if m <= 8:
        return m                        # block dim == full array dim is legal
    # Target ~2 MiB for one (tm, n) f32 working tile.  A handful of full-tile
    # temporaries (work, out, col, masks) plus the double-buffered in/out
    # blocks then stay well under the default scoped VMEM on every generation
    # (16 MiB on v5e, 32 MiB on v6e/v7x; 64 MiB physical on v7x).
    budget = 2 * 1024 * 1024
    tm = budget // (n * max(4, itemsize))
    tm = max(8, min(1024, int(tm)))
    tm -= tm % 8
    # Keep at least 2 grid steps when possible so v7x can shard the row axis
    # across both TensorCores.
    if tm >= m:
        half = -(-m // 2)
        tm = max(8, ((half + 7) // 8) * 8)
    return tm


def top_case_layer(x, k, *, training=True, row_tile=None):
    """JAX/Pallas equivalent of TopCaseLayer.forward."""
    if training:
        return x                        # identity path, no kernel needed

    m, n = x.shape
    assert 0 < k <= n, "k must be in (0, num_activations]"

    # Lane-dense stores: pad the activation axis to a multiple of 128 with a
    # most-negative value so padded lanes never enter the top-k; strip after.
    n_pad = (-n) % 128
    if n_pad:
        if jnp.issubdtype(x.dtype, jnp.floating):
            pad_val = -jnp.inf
        else:
            pad_val = jnp.iinfo(x.dtype).min
        x = jnp.pad(x, ((0, 0), (0, n_pad)), constant_values=pad_val)
    n_full = n + n_pad

    if row_tile is None:
        row_tile = _pick_row_tile(m, n_full, x.dtype.itemsize)

    kernel = functools.partial(_topk_mask_kernel, k=k)
    itemsize = x.dtype.itemsize
    cost = pl.CostEstimate(
        flops=6 * k * m * n_full,
        transcendentals=0,
        bytes_accessed=2 * m * n_full * itemsize,
    )

    out = pl.pallas_call(
        kernel,
        out_shape=jax.ShapeDtypeStruct((m, n_full), x.dtype),
        grid_spec=pltpu.PrefetchScalarGridSpec(
            num_scalar_prefetch=0,
            grid=(pl.cdiv(m, row_tile),),                 # tail block is masked
            in_specs=[pl.BlockSpec((row_tile, n_full), lambda i: (i, 0))],
            out_specs=pl.BlockSpec((row_tile, n_full), lambda i: (i, 0)),
        ),
        compiler_params=pltpu.CompilerParams(
            dimension_semantics=("parallel",),
        ),
        cost_estimate=cost,
    )(x)

    if n_pad:
        out = out[:, :n]
    return out


def _reference(x, k):
    # Pure-JAX reference of the eval path (torch.topk + scatter).
    vals, idx = lax.top_k(x, k)
    rows = jnp.arange(x.shape[0])[:, None]
    return jnp.zeros_like(x).at[rows, idx].set(vals)


if __name__ == "__main__":
    key = jax.random.PRNGKey(0)
    M, N, K = 20, 256, 5                # small "m case activations" matrix
    x = jax.random.normal(key, (M, N), dtype=jnp.float32)

    # training=True branch: identity
    y_train = top_case_layer(x, K, training=True)
    assert jnp.array_equal(y_train, x)

    # eval branch: keep top-k per row, zero the rest (Pallas kernel).
    # M=20 is deliberately not a multiple of the auto-picked row tile (16)
    # to exercise the masked tail block.
    y = jax.block_until_ready(top_case_layer(x, K, training=False))

    y_ref = _reference(x, K)
    assert y.shape == x.shape
    assert int(jnp.count_nonzero(y)) == M * K
    assert jnp.allclose(y, y_ref, atol=1e-6)

    print("KERNEL_OK")
</pallas_src>

<mosaic_0001>
module attributes {stable_mosaic.version = 11 : i64} {
  func.func @_topk_mask_kernel(%arg0: i32, %arg1: memref<16x256xf32, #tpu.memory_space<vmem>>, %arg2: memref<16x256xf32, #tpu.memory_space<vmem>>) attributes {dimension_semantics = [#tpu.dimension_semantics<parallel>], iteration_bounds = array<i64: 2>, scalar_prefetch = 0 : i64, scratch_operands = 0 : i64, tpu.core_type = #tpu.core_type<tc>, window_params = [{transform_indices = @transform_0, window_bounds = array<i64: 16, 256>}, {transform_indices = @transform_1, window_bounds = array<i64: 16, 256>}]} {
    %c0 = arith.constant 0 : index
    %c0_0 = arith.constant 0 : index
    %0 = vector.load %arg1[%c0, %c0_0] : memref<16x256xf32, #tpu.memory_space<vmem>>, vector<16x256xf32>
    %1 = tpu.iota {dimensions = array<i32: 1>} : vector<16x256xi32>
    %cst = arith.constant 0.000000e+00 : f32
    %2 = vector.broadcast %cst : f32 to vector<16x256xf32>
    %cst_1 = arith.constant 0xFF800000 : f32
    %c0_i32 = arith.constant 0 : i32
    %cst_2 = arith.constant dense<0xFF800000> : vector<16xf32>
    %3 = vector.multi_reduction <maximumf>, %0, %cst_2 [1] : vector<16x256xf32> to vector<16xf32>
    %4 = vector.shape_cast %3 : vector<16xf32> to vector<16x1xf32>
    %5 = vector.broadcast %4 : vector<16x1xf32> to vector<16x256xf32>
    %6 = arith.cmpf oeq, %0, %5 : vector<16x256xf32>
    %c256_i32 = arith.constant 256 : i32
    %7 = vector.broadcast %c256_i32 : i32 to vector<16x256xi32>
    %8 = arith.select %6, %1, %7 : vector<16x256xi1>, vector<16x256xi32>
    %cst_3 = arith.constant dense<2147483647> : vector<16xi32>
    %9 = vector.multi_reduction <minsi>, %8, %cst_3 [1] : vector<16x256xi32> to vector<16xi32>
    %10 = vector.shape_cast %9 : vector<16xi32> to vector<16x1xi32>
    %11 = vector.broadcast %10 : vector<16x1xi32> to vector<16x256xi32>
    %12 = arith.cmpi eq, %1, %11 : vector<16x256xi32>
    %13 = arith.select %12, %0, %2 : vector<16x256xi1>, vector<16x256xf32>
    %14 = vector.broadcast %cst_1 : f32 to vector<16x256xf32>
    %15 = arith.select %12, %14, %0 : vector<16x256xi1>, vector<16x256xf32>
    %c1_i32 = arith.constant 1 : i32
    %cst_4 = arith.constant dense<0xFF800000> : vector<16xf32>
    %16 = vector.multi_reduction <maximumf>, %15, %cst_4 [1] : vector<16x256xf32> to vector<16xf32>
    %17 = vector.shape_cast %16 : vector<16xf32> to vector<16x1xf32>
    %18 = vector.broadcast %17 : vector<16x1xf32> to vector<16x256xf32>
    %19 = arith.cmpf oeq, %15, %18 : vector<16x256xf32>
    %c256_i32_5 = arith.constant 256 : i32
    %20 = vector.broadcast %c256_i32_5 : i32 to vector<16x256xi32>
    %21 = arith.select %19, %1, %20 : vector<16x256xi1>, vector<16x256xi32>
    %cst_6 = arith.constant dense<2147483647> : vector<16xi32>
    %22 = vector.multi_reduction <minsi>, %21, %cst_6 [1] : vector<16x256xi32> to vector<16xi32>
    %23 = vector.shape_cast %22 : vector<16xi32> to vector<16x1xi32>
    %24 = vector.broadcast %23 : vector<16x1xi32> to vector<16x256xi32>
    %25 = arith.cmpi eq, %1, %24 : vector<16x256xi32>
    %26 = arith.select %25, %0, %13 : vector<16x256xi1>, vector<16x256xf32>
    %27 = vector.broadcast %cst_1 : f32 to vector<16x256xf32>
    %28 = arith.select %25, %27, %15 : vector<16x256xi1>, vector<16x256xf32>
    %c2_i32 = arith.constant 2 : i32
    %cst_7 = arith.constant dense<0xFF800000> : vector<16xf32>
    %29 = vector.multi_reduction <maximumf>, %28, %cst_7 [1] : vector<16x256xf32> to vector<16xf32>
    %30 = vector.shape_cast %29 : vector<16xf32> to vector<16x1xf32>
    %31 = vector.broadcast %30 : vector<16x1xf32> to vector<16x256xf32>
    %32 = arith.cmpf oeq, %28, %31 : vector<16x256xf32>
    %c256_i32_8 = arith.constant 256 : i32
    %33 = vector.broadcast %c256_i32_8 : i32 to vector<16x256xi32>
    %34 = arith.select %32, %1, %33 : vector<16x256xi1>, vector<16x256xi32>
    %cst_9 = arith.constant dense<2147483647> : vector<16xi32>
    %35 = vector.multi_reduction <minsi>, %34, %cst_9 [1] : vector<16x256xi32> to vector<16xi32>
    %36 = vector.shape_cast %35 : vector<16xi32> to vector<16x1xi32>
    %37 = vector.broadcast %36 : vector<16x1xi32> to vector<16x256xi32>
    %38 = arith.cmpi eq, %1, %37 : vector<16x256xi32>
    %39 = arith.select %38, %0, %26 : vector<16x256xi1>, vector<16x256xf32>
    %40 = vector.broadcast %cst_1 : f32 to vector<16x256xf32>
    %41 = arith.select %38, %40, %28 : vector<16x256xi1>, vector<16x256xf32>
    %c3_i32 = arith.constant 3 : i32
    %cst_10 = arith.constant dense<0xFF800000> : vector<16xf32>
    %42 = vector.multi_reduction <maximumf>, %41, %cst_10 [1] : vector<16x256xf32> to vector<16xf32>
    %43 = vector.shape_cast %42 : vector<16xf32> to vector<16x1xf32>
    %44 = vector.broadcast %43 : vector<16x1xf32> to vector<16x256xf32>
    %45 = arith.cmpf oeq, %41, %44 : vector<16x256xf32>
    %c256_i32_11 = arith.constant 256 : i32
    %46 = vector.broadcast %c256_i32_11 : i32 to vector<16x256xi32>
    %47 = arith.select %45, %1, %46 : vector<16x256xi1>, vector<16x256xi32>
    %cst_12 = arith.constant dense<2147483647> : vector<16xi32>
    %48 = vector.multi_reduction <minsi>, %47, %cst_12 [1] : vector<16x256xi32> to vector<16xi32>
    %49 = vector.shape_cast %48 : vector<16xi32> to vector<16x1xi32>
    %50 = vector.broadcast %49 : vector<16x1xi32> to vector<16x256xi32>
    %51 = arith.cmpi eq, %1, %50 : vector<16x256xi32>
    %52 = arith.select %51, %0, %39 : vector<16x256xi1>, vector<16x256xf32>
    %53 = vector.broadcast %cst_1 : f32 to vector<16x256xf32>
    %54 = arith.select %51, %53, %41 : vector<16x256xi1>, vector<16x256xf32>
    %c4_i32 = arith.constant 4 : i32
    %cst_13 = arith.constant dense<0xFF800000> : vector<16xf32>
    %55 = vector.multi_reduction <maximumf>, %54, %cst_13 [1] : vector<16x256xf32> to vector<16xf32>
    %56 = vector.shape_cast %55 : vector<16xf32> to vector<16x1xf32>
    %57 = vector.broadcast %56 : vector<16x1xf32> to vector<16x256xf32>
    %58 = arith.cmpf oeq, %54, %57 : vector<16x256xf32>
    %c256_i32_14 = arith.constant 256 : i32
    %59 = vector.broadcast %c256_i32_14 : i32 to vector<16x256xi32>
    %60 = arith.select %58, %1, %59 : vector<16x256xi1>, vector<16x256xi32>
    %cst_15 = arith.constant dense<2147483647> : vector<16xi32>
    %61 = vector.multi_reduction <minsi>, %60, %cst_15 [1] : vector<16x256xi32> to vector<16xi32>
    %62 = vector.shape_cast %61 : vector<16xi32> to vector<16x1xi32>
    %63 = vector.broadcast %62 : vector<16x1xi32> to vector<16x256xi32>
    %64 = arith.cmpi eq, %1, %63 : vector<16x256xi32>
    %65 = arith.select %64, %0, %52 : vector<16x256xi1>, vector<16x256xf32>
    %66 = vector.broadcast %cst_1 : f32 to vector<16x256xf32>
    %67 = arith.select %64, %66, %54 : vector<16x256xi1>, vector<16x256xf32>
    %c0_16 = arith.constant 0 : index
    %c0_17 = arith.constant 0 : index
    %68 = vector.load %arg2[%c0_16, %c0_17] : memref<16x256xf32, #tpu.memory_space<vmem>>, vector<16x256xf32>
    tpu.vector_store %arg2[%c0_16, %c0_17], %65 {strides = array<i32>} : memref<16x256xf32, #tpu.memory_space<vmem>>, vector<16x256xf32>,
    return
  }
  func.func @transform_0(%arg0: i32) -> (i32, i32) {
    %c0_i32 = arith.constant 0 : i32
    %c0_i32_0 = arith.constant 0 : i32
    return %arg0, %c0_i32 : i32, i32
  }
  func.func @transform_1(%arg0: i32) -> (i32, i32) {
    %c0_i32 = arith.constant 0 : i32
    %c0_i32_0 = arith.constant 0 : i32
    return %arg0, %c0_i32 : i32, i32
  }
}

</mosaic_0001>

<bundles_post_ra>
// kernel: tpu_custom_call.1
= control target key start
LH: loop header
LB: loop body
LE: loop exit
PB: predicated region body
PF: predicated region fallthrough
CT: control target
= control target key end

     0   :  { %6 = vsyncpa [#allocation3], 0  ;;  %s1014_s0 = inlined_call_operand.hbm [shape: f32[20,256], index: 0, kind: input, shape index: {}]   ;;  %s1015_s1 = inlined_call_operand.hbm [shape: f32[20,256], index: 1, kind: output, shape index: {}]  }
   0x1   :  { %8 = vsyncpa [#allocation3 + $0x1], 0 }
   0x2   :  { %9 = vsyncpa [#allocation4], 0 }
   0x3   :  { %11 = vsyncpa [#allocation4 + $0x1], 0  ;;  %s734_s6 = smov 0   ;;  %s736_s7 = smov 0  }
   0x4   :  { %s738_s8 = smov 0   ;;  %s740_s9 = smov 0  }
   0x5 LB: > { %s755_s10 = sadd.s32 4294967295, %s716_s9   ;;  %s547_s11 = sadd.s32 4294967294, %s716_s9   ;;  %s716_s9 = sphi %s740_s9, %s1025_s9   ;;  %s712_s8 = sphi %s738_s8, %s1024_s8   ;;  %s708_s7 = sphi %s736_s7, %s1023_s7   ;;  %s704_s6 = sphi %s734_s6, %s1022_s6  }
   0x6   : > { %s759_s12 = sadd.s32 1, %s716_s9   ;;  %s24_s13 = sadd.s32 1, %s712_s8 }
   0x7   : > { %s21_s14 = ssub.s32 %s716_s9, %s759_s12  ;;  %p31_p0 = scmp.ne.s32.totalorder %s712_s8, %s708_s7 }
   0x8   : > { %p22_p1 = scmp.eq.s32.totalorder %s21_s14, 0  ;;  %p32_p2 = scmp.eq.s32.totalorder %s716_s9, 0 }
   0x9   : > { %p37_p3 = scmp.ne.s32.totalorder %s708_s7, %s704_s6  ;;  %p38_p4 = scmp.eq.s32.totalorder %s755_s10, 0 }
   0xa   : > { %s771_s15 = scalar_select %p22_p1, %s712_s8, %s24_s13  }
   0xb   : > { %p33_p5 = por %p32_p2, %p31_p0  ;;  %p773_p6 = por %p38_p4, %p37_p3 }
   0xc   : > { %p61_p7 = scmp.eq.s32.totalorder %s755_s10, 1  ;;  %p67_p8 = scmp.eq.s32.totalorder %s547_s11, 1 }
   0xd   : > { %p1016_p11 = scmp.ge.s32.totalorder %s716_s9, 2 }
   0xe   : > { %p778_p9 = por %p61_p7, %p31_p0  ;;  %p782_p10 = por %p67_p8, %p37_p3 }
   0xf   : > { %83 = sbr.rel (%p1016_p11) target bundleno = 57 (0x39), region = 16 }
  0x10   : > { %s1019_s18 = scalar_select %p782_p10, 1, 0 }
  0x16   : > { %86 = sbr.rel (!%p33_p5) target bundleno = 57 (0x39), region = 20  ;;  %s87_s19 = sand.u32 (%p33_p5), 1, %s712_s8  }
  0x17   : > { %s551_s20 = sshll.u32 (%p33_p5), %s716_s9, 1  ;;  %s550_s21 = sshll.u32 (%p33_p5), %s87_s19, 5 }
  0x18   : > { %s93_s22 = ssub.s32 (%p33_p5), 3, %s551_s20  ;;  %s794_s25 = scalar_lea.sflag (%p33_p5), [#allocation3], %s87_s19 }
  0x19   : > { %p94_p12 = scmp.lt.s32.totalorder (%p33_p5), %s93_s22, 2  ;;  %s91_s26 = scalar_lea.vmem (%p33_p5), [#allocation2], %s550_s21 }
  0x1d   : > { %s1027_s22 = smov (!%p94_p12, %s93_s22), 2 }
  0x1e   : > { %s791_s23 = sshll.u32 %s1027_s22, 8 }
  0x1f   : > { %s99_s24 = ssub.s32 512, %s791_s23 }
  0x20   : > { %100 = vsyncadd %s794_s25, %s99_s24  ;;  %p554_p13 = scmp.ne.s32.totalorder %s791_s23, 0  ;;  %s575_s27 = sshll.u32 %s716_s9, 9 }
  0x21   : > { %s802_s30 = scalar_lea.hbm %s1014_s0, %s575_s27  ;;  %s106_s2 = sshll.u32 %s91_s26, 4  ;;  %s804_s2 = int_to_ptr.vmem [resolvable:$true] %s106_s2 }
  0x22   : > { %s622_s3 = scalar_lea.hbm %s802_s30, %s791_s23  ;;  %s626_s11 = scalar_lea.hbm %s1014_s0, 768 }
  0x23   : > { %p623_p0 = scmp.ne.s32.totalorder %s802_s30, %s622_s3  ;;  %p627_p3 = scmp.lt.u32.totalorder %s802_s30, %s1014_s0 }
  0x24   : > { %p628_p4 = scmp.lt.u32.totalorder %s626_s11, %s622_s3  ;;  %p630_p7 = scmp.lt.u32.totalorder %s622_s3, %s802_s30 }
  0x25   : > { %p624_p1 = pnand %p623_p0, %p554_p13 }
  0x26   : > { %p629_p5 = por %p628_p4, %p627_p3 }
  0x27   : > { %p625_p2 = pneg %p624_p1 }
  0x28   : > { %p631_p8 = por %p630_p7, %p629_p5 }
  0x2a   : > { %p632_p12 = pnand %p631_p8, %p625_p2 }
  0x2c   : > { %635 = shalt.err (!%p632_p12)
}
  0x2d   : > { %s636_s19 = scalar_lea.vmem %s804_s2, %s791_s23  ;;  %s718_s20 = smov [#allocation2]  }
  0x2e   : > { %p637_p0 = scmp.ne.s32.totalorder %s804_s2, %s636_s19  ;;  %s640_s21 = sshll.u32 %s718_s20, 4  ;;  %s641_s21 = int_to_ptr.vmem [resolvable:$false] %s640_s21 }
  0x2f   : > { %s642_s22 = scalar_lea.vmem %s641_s21, 1024  ;;  %p643_p10 = scmp.lt.s32.totalorder %s804_s2, %s641_s21 }
  0x30   : > { %p638_p1 = pnand %p637_p0, %p554_p13  ;;  %p644_p3 = scmp.lt.s32.totalorder %s642_s22, %s636_s19 }
  0x32   : > { %p639_p11 = pneg %p638_p1  ;;  %p645_p4 = por %p644_p3, %p643_p10 }
  0x34   : > { %p646_p5 = pnand %p645_p4, %p639_p11 }
  0x36   : > { %649 = shalt.err (!%p646_p5)
}
  0x37   : > { %s719_s24 = smov 256   ;;  %s720_s26 = smov 16  }
  0x38   : > { %112 = dma.hbm_to_vmem [thread:$0]  (%p554_p13), %s802_s30, %s791_s23, %s804_s2, %s794_s25, %s719_s24, %s719_s24, %s720_s26  }
  0x39 PF: > { %p559_p2 = scmp.ge.s32.totalorder %s716_s9, 1  ;;  %p114_p7 = scmp.lt.s32.totalorder %s716_s9, 3 }
  0x3b   : > { %p115_p8 = pnand %p559_p2, %p114_p7 }
  0x3c   : > { %s834_s27 = sand.u32 (!%p115_p8), 1, %s708_s7  }
  0x3d   : > { %118 = sbr.rel (%p115_p8) target bundleno = 2323 (0x913), region = 24  ;;  %s560_s28 = sshll.u32 (!%p115_p8), %s834_s27, 5 }
  0x3e   : > { %s121_s29 = scalar_lea.sflag (!%p115_p8), [#allocation3], %s834_s27  ;;  %s124_s3 = scalar_lea.vmem (!%p115_p8), [#allocation2], %s560_s28 }
  0x44   : > { %695 = dma.done.wait (%p773_p6), %s121_s29, 512  }
  0x45   : > { %697 = vsyncadd (%p773_p6), %s121_s29, 4294966784  ;;  %v844_v0 = vld [vmem:[%s124_s3] sm:$0xff]  ;;  %v846_v1 = vld [vmem:[%s124_s3 + $0x8] sm:$0xff]  ;;  %v159_v6 = vlaneseq  ;;  %s142_s16 = scalar_lea.vmem [#allocation5], %s560_s28  ;;  %s453_s23 = scalar_lea.sflag [#allocation4], %s834_s27 }
  0x46   : > { %v848_v2 = vld [vmem:[%s124_s3 + $0x10] sm:$0xff]  ;;  %v162_v3 = vmax.f32 %v844_v0, %v846_v1  ;;  %v852_v4 = vld [vmem:[%s124_s3 + $0x18] sm:$0xff]  ;;  %s563_s25 = sshll.u32 (%p778_p9), %s755_s10, 1 }
  0x47   : > { %v165_v5 = vmax.f32 %v848_v2, %v852_v4  ;;  %v856_v7 = vand.u32 127, %v159_v6  ;;  %s461_s30 = ssub.s32 (%p778_p9), 3, %s563_s25 }
  0x48   : > { %163 = vmax.xlane.f32.xlu0 %v162_v3  ;;  %p462_p6 = scmp.lt.s32.totalorder (%p778_p9), %s461_s30, 2 }
  0x49   : > { %v859_v8 = vadd.s32 128, %v856_v7 }
  0x4c   : > { %166 = vmax.xlane.f32.xlu0 %v165_v5 }
  0xd5   : > { %v164_v9 = vpop.xlane.xlu0 %163 }
  0xd6   : > { %vm168_vm0 = vcmp.eq.f32.partialorder %v844_v0, %v164_v9  ;;  %vm169_vm1 = vcmp.eq.f32.partialorder %v846_v1, %v164_v9 }
  0xd7   : > { %v172_v10 = vsel %vm168_vm0, %v856_v7, 256  ;;  %v173_v11 = vsel %vm169_vm1, %v859_v8, 256 }
  0xd8   : > { %vm176_vm2 = vcmp.lt.s32.totalorder %v172_v10, %v173_v11 }
  0xd9   : > { %v167_v12 = vpop.xlane.xlu0 %166  ;;  %v177_v13 = vsel %vm176_vm2, %v172_v10, %v173_v11 }
  0xda   : > { %vm170_vm3 = vcmp.eq.f32.partialorder %v848_v2, %v167_v12  ;;  %vm171_vm4 = vcmp.eq.f32.partialorder %v852_v4, %v167_v12  ;;  %v179_v14 = vshra.s32 %v177_v13, 16  ;;  %v178_v21 = vand.u32 65535, %v177_v13 }
  0xdb   : > { %v174_v15 = vsel %vm170_vm3, %v856_v7, 256  ;;  %v175_v16 = vsel %vm171_vm4, %v859_v8, 256 }
  0xdc   : > { %vm192_vm5 = vcmp.lt.s32.totalorder %v174_v15, %v175_v16  ;;  %v181_v17 = vcvt.s32.f32 %v179_v14  ;;  %v180_v23 = vcvt.s32.f32 %v178_v21 }
  0xdd   : > { %v193_v18 = vsel %vm192_vm5, %v174_v15, %v175_v16 }
  0xde   : > { %182 = vmin.xlane.f32.xlu1 %v181_v17  ;;  %v195_v19 = vshra.s32 %v193_v18, 16  ;;  %v194_v24 = vand.u32 65535, %v193_v18 }
  0xe0   : > { %v197_v20 = vcvt.s32.f32 %v195_v19  ;;  %v196_v27 = vcvt.s32.f32 %v194_v24 }
  0xe2   : > { %198 = vmin.xlane.f32.xlu1 %v197_v20 }
 0x16b   : > { %v183_v22 = vpop.xlane.xlu1 %182 }
 0x16c   : > { %vm184_vm6 = vcmp.eq.f32.partialorder %v181_v17, %v183_v22  ;;  %v189_v29 = vcvt.f32.s32 %v183_v22 }
 0x16d   : > { %v185_v25 = vsel %vm184_vm6, %v180_v23, inf }
 0x16e   : > { %186 = vmin.xlane.f32.xlu0 %v185_v25  ;;  %v190_v31 = vshll.u32 %v189_v29, 16 }
 0x16f   : > { %v199_v26 = vpop.xlane.xlu1 %198 }
 0x170   : > { %vm200_vm7 = vcmp.eq.f32.partialorder %v197_v20, %v199_v26  ;;  %v205_v32 = vcvt.f32.s32 %v199_v26 }
 0x171   : > { %v201_v28 = vsel %vm200_vm7, %v196_v27, inf }
 0x172   : > { %202 = vmin.xlane.f32.xlu1 %v201_v28  ;;  %v206_v36 = vshll.u32 %v205_v32, 16 }
 0x1fb   : > { %v187_v30 = vpop.xlane.xlu0 %186 }
 0x1fc   : > { %v188_v33 = vcvt.f32.s32 %v187_v30 }
 0x1fe   : > { %v191_v34 = vadd.s32 %v190_v31, %v188_v33 }
 0x1ff   : > { %v203_v35 = vpop.xlane.xlu1 %202 }
 0x200   : > { %vm208_vm8 = vcmp.eq.s32.totalorder %v856_v7, %v191_v34  ;;  %vm209_vm9 = vcmp.eq.s32.totalorder %v859_v8, %v191_v34  ;;  %v204_v37 = vcvt.f32.s32 %v203_v35 }
 0x201   : > { %v216_v38 = vsel %vm208_vm8, -inf, %v844_v0  ;;  %v217_v39 = vsel %vm209_vm9, -inf, %v846_v1  ;;  %v212_v13 = vsel %vm208_vm8, %v844_v0, 0.0  ;;  %v213_v14 = vsel %vm209_vm9, %v846_v1, 0.0 }
 0x202   : > { %v207_v40 = vadd.s32 %v206_v36, %v204_v37  ;;  %v220_v41 = vmax.f32 %v216_v38, %v217_v39 }
 0x204   : > { %vm210_vm10 = vcmp.eq.s32.totalorder %v856_v7, %v207_v40  ;;  %vm211_vm11 = vcmp.eq.s32.totalorder %v859_v8, %v207_v40  ;;  %221 = vmax.xlane.f32.xlu0 %v220_v41 }
 0x205   : > { %v882_v42 = vsel %vm210_vm10, -inf, %v848_v2  ;;  %v219_v43 = vsel %vm211_vm11, -inf, %v852_v4  ;;  %v214_v24 = vsel %vm210_vm10, %v848_v2, 0.0  ;;  %v215_v25 = vsel %vm211_vm11, %v852_v4, 0.0 }
 0x206   : > { %v223_v44 = vmax.f32 %v882_v42, %v219_v43 }
 0x208   : > { %224 = vmax.xlane.f32.xlu1 %v223_v44 }
 0x291   : > { %v222_v45 = vpop.xlane.xlu0 %221 }
 0x292   : > { %vm226_vm12 = vcmp.eq.f32.partialorder %v216_v38, %v222_v45  ;;  %vm227_vm13 = vcmp.eq.f32.partialorder %v217_v39, %v222_v45 }
 0x293   : > { %v230_v46 = vsel %vm226_vm12, %v856_v7, 256  ;;  %v231_v47 = vsel %vm227_vm13, %v859_v8, 256 }
 0x294   : > { %vm234_vm14 = vcmp.lt.s32.totalorder %v230_v46, %v231_v47 }
 0x295   : > { %v225_v48 = vpop.xlane.xlu1 %224  ;;  %v235_v49 = vsel %vm234_vm14, %v230_v46, %v231_v47 }
 0x296   : > { %vm228_vm15 = vcmp.eq.f32.partialorder %v882_v42, %v225_v48  ;;  %vm229_vm0 = vcmp.eq.f32.partialorder %v219_v43, %v225_v48  ;;  %v237_v50 = vshra.s32 %v235_v49, 16  ;;  %v236_v57 = vand.u32 65535, %v235_v49 }
 0x297   : > { %v232_v51 = vsel %vm228_vm15, %v856_v7, 256  ;;  %v233_v52 = vsel %vm229_vm0, %v859_v8, 256 }
 0x298   : > { %vm250_vm1 = vcmp.lt.s32.totalorder %v232_v51, %v233_v52  ;;  %v239_v53 = vcvt.s32.f32 %v237_v50  ;;  %v238_v59 = vcvt.s32.f32 %v236_v57 }
 0x299   : > { %v251_v54 = vsel %vm250_vm1, %v232_v51, %v233_v52 }
 0x29a   : > { %240 = vmin.xlane.f32.xlu0 %v239_v53  ;;  %v253_v55 = vshra.s32 %v251_v54, 16  ;;  %v252_v60 = vand.u32 65535, %v251_v54 }
 0x29c   : > { %v255_v56 = vcvt.s32.f32 %v253_v55  ;;  %v254_v63 = vcvt.s32.f32 %v252_v60 }
 0x29e   : > { %256 = vmin.xlane.f32.xlu1 %v255_v56 }
 0x327   : > { %v241_v58 = vpop.xlane.xlu0 %240 }
 0x328   : > { %vm242_vm2 = vcmp.eq.f32.partialorder %v239_v53, %v241_v58  ;;  %v247_v5 = vcvt.f32.s32 %v241_v58 }
 0x329   : > { %v243_v61 = vsel %vm242_vm2, %v238_v59, inf }
 0x32a   : > { %244 = vmin.xlane.f32.xlu0 %v243_v61  ;;  %v248_v9 = vshll.u32 %v247_v5, 16 }
 0x32b   : > { %v257_v62 = vpop.xlane.xlu1 %256 }
 0x32c   : > { %vm258_vm3 = vcmp.eq.f32.partialorder %v255_v56, %v257_v62  ;;  %v263_v10 = vcvt.f32.s32 %v257_v62 }
 0x32d   : > { %v259_v3 = vsel %vm258_vm3, %v254_v63, inf }
 0x32e   : > { %260 = vmin.xlane.f32.xlu1 %v259_v3  ;;  %v264_v16 = vshll.u32 %v263_v10, 16 }
 0x3b7   : > { %v245_v6 = vpop.xlane.xlu0 %244 }
 0x3b8   : > { %v246_v11 = vcvt.f32.s32 %v245_v6 }
 0x3ba   : > { %v249_v12 = vadd.s32 %v248_v9, %v246_v11 }
 0x3bb   : > { %v261_v15 = vpop.xlane.xlu1 %260 }
 0x3bc   : > { %vm266_vm4 = vcmp.eq.s32.totalorder %v856_v7, %v249_v12  ;;  %vm267_vm5 = vcmp.eq.s32.totalorder %v859_v8, %v249_v12  ;;  %v262_v17 = vcvt.f32.s32 %v261_v15 }
 0x3bd   : > { %v270_v18 = vsel %vm266_vm4, %v844_v0, %v212_v13  ;;  %v271_v19 = vsel %vm267_vm5, %v846_v1, %v213_v14  ;;  %v274_v20 = vsel %vm266_vm4, -inf, %v216_v38  ;;  %v275_v21 = vsel %vm267_vm5, -inf, %v217_v39 }
 0x3be   : > { %v265_v22 = vadd.s32 %v264_v16, %v262_v17  ;;  %v278_v23 = vmax.f32 %v274_v20, %v275_v21 }
 0x3c0   : > { %vm268_vm6 = vcmp.eq.s32.totalorder %v856_v7, %v265_v22  ;;  %vm269_vm7 = vcmp.eq.s32.totalorder %v859_v8, %v265_v22  ;;  %279 = vmax.xlane.f32.xlu0 %v278_v23 }
 0x3c1   : > { %v272_v26 = vsel %vm268_vm6, %v848_v2, %v214_v24  ;;  %v273_v27 = vsel %vm269_vm7, %v852_v4, %v215_v25  ;;  %v276_v28 = vsel %vm268_vm6, -inf, %v882_v42  ;;  %v277_v29 = vsel %vm269_vm7, -inf, %v219_v43 }
 0x3c2   : > { %v281_v30 = vmax.f32 %v276_v28, %v277_v29 }
 0x3c4   : > { %282 = vmax.xlane.f32.xlu1 %v281_v30 }
 0x44d   : > { %v280_v31 = vpop.xlane.xlu0 %279 }
 0x44e   : > { %vm284_vm8 = vcmp.eq.f32.partialorder %v274_v20, %v280_v31  ;;  %vm285_vm9 = vcmp.eq.f32.partialorder %v275_v21, %v280_v31 }
 0x44f   : > { %v288_v32 = vsel %vm284_vm8, %v856_v7, 256  ;;  %v289_v33 = vsel %vm285_vm9, %v859_v8, 256 }
 0x450   : > { %vm292_vm10 = vcmp.lt.s32.totalorder %v288_v32, %v289_v33 }
 0x451   : > { %v283_v34 = vpop.xlane.xlu1 %282  ;;  %v293_v35 = vsel %vm292_vm10, %v288_v32, %v289_v33 }
 0x452   : > { %vm286_vm11 = vcmp.eq.f32.partialorder %v276_v28, %v283_v34  ;;  %vm287_vm12 = vcmp.eq.f32.partialorder %v277_v29, %v283_v34  ;;  %v295_v36 = vshra.s32 %v293_v35, 16  ;;  %v294_v43 = vand.u32 65535, %v293_v35 }
 0x453   : > { %v290_v37 = vsel %vm286_vm11, %v856_v7, 256  ;;  %v291_v38 = vsel %vm287_vm12, %v859_v8, 256 }
 0x454   : > { %vm308_vm13 = vcmp.lt.s32.totalorder %v290_v37, %v291_v38  ;;  %v297_v39 = vcvt.s32.f32 %v295_v36  ;;  %v296_v45 = vcvt.s32.f32 %v294_v43 }
 0x455   : > { %v309_v40 = vsel %vm308_vm13, %v290_v37, %v291_v38 }
 0x456   : > { %298 = vmin.xlane.f32.xlu0 %v297_v39  ;;  %v311_v41 = vshra.s32 %v309_v40, 16  ;;  %v310_v46 = vand.u32 65535, %v309_v40 }
 0x458   : > { %v313_v42 = vcvt.s32.f32 %v311_v41  ;;  %v312_v49 = vcvt.s32.f32 %v310_v46 }
 0x45a   : > { %314 = vmin.xlane.f32.xlu1 %v313_v42 }
 0x4e3   : > { %v299_v44 = vpop.xlane.xlu0 %298 }
 0x4e4   : > { %vm300_vm14 = vcmp.eq.f32.partialorder %v297_v39, %v299_v44  ;;  %v305_v51 = vcvt.f32.s32 %v299_v44 }
 0x4e5   : > { %v301_v47 = vsel %vm300_vm14, %v296_v45, inf }
 0x4e6   : > { %302 = vmin.xlane.f32.xlu0 %v301_v47  ;;  %v306_v53 = vshll.u32 %v305_v51, 16 }
 0x4e7   : > { %v315_v48 = vpop.xlane.xlu1 %314 }
 0x4e8   : > { %vm316_vm15 = vcmp.eq.f32.partialorder %v313_v42, %v315_v48  ;;  %v321_v54 = vcvt.f32.s32 %v315_v48 }
 0x4e9   : > { %v317_v50 = vsel %vm316_vm15, %v312_v49, inf }
 0x4ea   : > { %318 = vmin.xlane.f32.xlu1 %v317_v50  ;;  %v322_v58 = vshll.u32 %v321_v54, 16 }
 0x573   : > { %v303_v52 = vpop.xlane.xlu0 %302 }
 0x574   : > { %v304_v55 = vcvt.f32.s32 %v303_v52 }
 0x576   : > { %v307_v56 = vadd.s32 %v306_v53, %v304_v55 }
 0x577   : > { %v319_v57 = vpop.xlane.xlu1 %318 }
 0x578   : > { %vm324_vm0 = vcmp.eq.s32.totalorder %v856_v7, %v307_v56  ;;  %vm325_vm1 = vcmp.eq.s32.totalorder %v859_v8, %v307_v56  ;;  %v320_v59 = vcvt.f32.s32 %v319_v57 }
 0x579   : > { %v328_v60 = vsel %vm324_vm0, %v844_v0, %v270_v18  ;;  %v329_v61 = vsel %vm325_vm1, %v846_v1, %v271_v19  ;;  %v332_v62 = vsel %vm324_vm0, -inf, %v274_v20  ;;  %v333_v63 = vsel %vm325_vm1, -inf, %v275_v21 }
 0x57a   : > { %v323_v3 = vadd.s32 %v322_v58, %v320_v59  ;;  %v336_v5 = vmax.f32 %v332_v62, %v333_v63 }
 0x57c   : > { %vm326_vm2 = vcmp.eq.s32.totalorder %v856_v7, %v323_v3  ;;  %vm327_vm3 = vcmp.eq.s32.totalorder %v859_v8, %v323_v3  ;;  %337 = vmax.xlane.f32.xlu0 %v336_v5 }
 0x57d   : > { %v330_v6 = vsel %vm326_vm2, %v848_v2, %v272_v26  ;;  %v331_v9 = vsel %vm327_vm3, %v852_v4, %v273_v27  ;;  %v334_v10 = vsel %vm326_vm2, -inf, %v276_v28  ;;  %v335_v11 = vsel %vm327_vm3, -inf, %v277_v29 }
 0x57e   : > { %v339_v12 = vmax.f32 %v334_v10, %v335_v11 }
 0x580   : > { %340 = vmax.xlane.f32.xlu1 %v339_v12 }
 0x609   : > { %v338_v13 = vpop.xlane.xlu0 %337 }
 0x60a   : > { %vm342_vm4 = vcmp.eq.f32.partialorder %v332_v62, %v338_v13  ;;  %vm343_vm5 = vcmp.eq.f32.partialorder %v333_v63, %v338_v13 }
 0x60b   : > { %v346_v14 = vsel %vm342_vm4, %v856_v7, 256  ;;  %v347_v15 = vsel %vm343_vm5, %v859_v8, 256 }
 0x60c   : > { %vm350_vm6 = vcmp.lt.s32.totalorder %v346_v14, %v347_v15 }
 0x60d   : > { %v341_v16 = vpop.xlane.xlu1 %340  ;;  %v351_v17 = vsel %vm350_vm6, %v346_v14, %v347_v15 }
 0x60e   : > { %vm344_vm7 = vcmp.eq.f32.partialorder %v334_v10, %v341_v16  ;;  %vm345_vm8 = vcmp.eq.f32.partialorder %v335_v11, %v341_v16  ;;  %v353_v18 = vshra.s32 %v351_v17, 16  ;;  %v352_v25 = vand.u32 65535, %v351_v17 }
 0x60f   : > { %v348_v19 = vsel %vm344_vm7, %v856_v7, 256  ;;  %v349_v20 = vsel %vm345_vm8, %v859_v8, 256 }
 0x610   : > { %vm366_vm9 = vcmp.lt.s32.totalorder %v348_v19, %v349_v20  ;;  %v355_v21 = vcvt.s32.f32 %v353_v18  ;;  %v354_v27 = vcvt.s32.f32 %v352_v25 }
 0x611   : > { %v367_v22 = vsel %vm366_vm9, %v348_v19, %v349_v20 }
 0x612   : > { %356 = vmin.xlane.f32.xlu0 %v355_v21  ;;  %v369_v23 = vshra.s32 %v367_v22, 16  ;;  %v368_v28 = vand.u32 65535, %v367_v22 }
 0x614   : > { %v371_v24 = vcvt.s32.f32 %v369_v23  ;;  %v370_v31 = vcvt.s32.f32 %v368_v28 }
 0x616   : > { %372 = vmin.xlane.f32.xlu1 %v371_v24 }
 0x69f   : > { %v357_v26 = vpop.xlane.xlu0 %356 }
 0x6a0   : > { %vm358_vm10 = vcmp.eq.f32.partialorder %v355_v21, %v357_v26  ;;  %v363_v33 = vcvt.f32.s32 %v357_v26 }
 0x6a1   : > { %v359_v29 = vsel %vm358_vm10, %v354_v27, inf }
 0x6a2   : > { %360 = vmin.xlane.f32.xlu0 %v359_v29  ;;  %v364_v35 = vshll.u32 %v363_v33, 16 }
 0x6a3   : > { %v373_v30 = vpop.xlane.xlu1 %372 }
 0x6a4   : > { %vm374_vm11 = vcmp.eq.f32.partialorder %v371_v24, %v373_v30  ;;  %v379_v36 = vcvt.f32.s32 %v373_v30 }
 0x6a5   : > { %v375_v32 = vsel %vm374_vm11, %v370_v31, inf }
 0x6a6   : > { %376 = vmin.xlane.f32.xlu1 %v375_v32  ;;  %v380_v40 = vshll.u32 %v379_v36, 16 }
 0x72f   : > { %v361_v34 = vpop.xlane.xlu0 %360 }
 0x730   : > { %v362_v37 = vcvt.f32.s32 %v361_v34 }
 0x732   : > { %v365_v38 = vadd.s32 %v364_v35, %v362_v37 }
 0x733   : > { %v377_v39 = vpop.xlane.xlu1 %376 }
 0x734   : > { %v378_v41 = vcvt.f32.s32 %v377_v39  ;;  %vm382_vm12 = vcmp.eq.s32.totalorder %v856_v7, %v365_v38  ;;  %vm383_vm13 = vcmp.eq.s32.totalorder %v859_v8, %v365_v38 }
 0x735   : > { %v387_v42 = vsel %vm383_vm13, %v846_v1, %v329_v61  ;;  %v390_v43 = vsel %vm382_vm12, -inf, %v332_v62  ;;  %v391_v44 = vsel %vm383_vm13, -inf, %v333_v63  ;;  %v386_v45 = vsel %vm382_vm12, %v844_v0, %v328_v60 }
 0x736   : > { %v381_v46 = vadd.s32 %v380_v40, %v378_v41  ;;  %v394_v47 = vmax.f32 %v390_v43, %v391_v44 }
 0x738   : > { %395 = vmax.xlane.f32.xlu0 %v394_v47  ;;  %vm384_vm14 = vcmp.eq.s32.totalorder %v856_v7, %v381_v46  ;;  %vm385_vm15 = vcmp.eq.s32.totalorder %v859_v8, %v381_v46 }
 0x739   : > { %v389_v48 = vsel %vm385_vm15, %v852_v4, %v331_v9  ;;  %v392_v49 = vsel %vm384_vm14, -inf, %v334_v10  ;;  %v393_v50 = vsel %vm385_vm15, -inf, %v335_v11  ;;  %v388_v51 = vsel %vm384_vm14, %v848_v2, %v330_v6 }
 0x73a   : > { %v397_v52 = vmax.f32 %v392_v49, %v393_v50 }
 0x73c   : > { %398 = vmax.xlane.f32.xlu1 %v397_v52 }
 0x7c5   : > { %v396_v53 = vpop.xlane.xlu0 %395 }
 0x7c6   : > { %vm400_vm0 = vcmp.eq.f32.partialorder %v390_v43, %v396_v53  ;;  %vm401_vm1 = vcmp.eq.f32.partialorder %v391_v44, %v396_v53 }
 0x7c7   : > { %v404_v54 = vsel %vm400_vm0, %v856_v7, 256  ;;  %v405_v55 = vsel %vm401_vm1, %v859_v8, 256 }
 0x7c8   : > { %vm408_vm2 = vcmp.lt.s32.totalorder %v404_v54, %v405_v55 }
 0x7c9   : > { %v399_v56 = vpop.xlane.xlu1 %398  ;;  %v409_v57 = vsel %vm408_vm2, %v404_v54, %v405_v55 }
 0x7ca   : > { %vm402_vm3 = vcmp.eq.f32.partialorder %v392_v49, %v399_v56  ;;  %vm403_vm4 = vcmp.eq.f32.partialorder %v393_v50, %v399_v56  ;;  %v411_v58 = vshra.s32 %v409_v57, 16  ;;  %v410_v5 = vand.u32 65535, %v409_v57 }
 0x7cb   : > { %v406_v59 = vsel %vm402_vm3, %v856_v7, 256  ;;  %v407_v60 = vsel %vm403_vm4, %v859_v8, 256 }
 0x7cc   : > { %vm424_vm5 = vcmp.lt.s32.totalorder %v406_v59, %v407_v60  ;;  %v413_v61 = vcvt.s32.f32 %v411_v58  ;;  %v412_v9 = vcvt.s32.f32 %v410_v5 }
 0x7cd   : > { %v425_v62 = vsel %vm424_vm5, %v406_v59, %v407_v60 }
 0x7ce   : > { %414 = vmin.xlane.f32.xlu0 %v413_v61  ;;  %v427_v63 = vshra.s32 %v425_v62, 16  ;;  %v426_v10 = vand.u32 65535, %v425_v62 }
 0x7d0   : > { %v429_v3 = vcvt.s32.f32 %v427_v63  ;;  %v428_v13 = vcvt.s32.f32 %v426_v10 }
 0x7d2   : > { %430 = vmin.xlane.f32.xlu1 %v429_v3 }
 0x85b   : > { %v415_v6 = vpop.xlane.xlu0 %414 }
 0x85c   : > { %vm416_vm6 = vcmp.eq.f32.partialorder %v413_v61, %v415_v6  ;;  %v421_v15 = vcvt.f32.s32 %v415_v6 }
 0x85d   : > { %v417_v11 = vsel %vm416_vm6, %v412_v9, inf }
 0x85e   : > { %418 = vmin.xlane.f32.xlu0 %v417_v11  ;;  %v422_v17 = vshll.u32 %v421_v15, 16 }
 0x85f   : > { %v431_v12 = vpop.xlane.xlu1 %430 }
 0x860   : > { %vm432_vm7 = vcmp.eq.f32.partialorder %v429_v3, %v431_v12  ;;  %v437_v18 = vcvt.f32.s32 %v431_v12 }
 0x861   : > { %v433_v14 = vsel %vm432_vm7, %v428_v13, inf }
 0x862   : > { %434 = vmin.xlane.f32.xlu1 %v433_v14  ;;  %v438_v22 = vshll.u32 %v437_v18, 16 }
 0x8eb   : > { %v419_v16 = vpop.xlane.xlu0 %418 }
 0x8ec   : > { %v420_v19 = vcvt.f32.s32 %v419_v16 }
 0x8ee   : > { %v423_v20 = vadd.s32 %v422_v17, %v420_v19 }
 0x8ef   : > { %v435_v21 = vpop.xlane.xlu1 %434 }
 0x8f0   : > { %vm440_vm8 = vcmp.eq.s32.totalorder %v856_v7, %v423_v20  ;;  %vm441_vm9 = vcmp.eq.s32.totalorder %v859_v8, %v423_v20  ;;  %v436_v23 = vcvt.f32.s32 %v435_v21  ;;  %459 = sbr.rel (!%p778_p9) target bundleno = 2323 (0x913), region = 32 }
 0x8f1   : > { %v444_v24 = vsel %vm440_vm8, %v844_v0, %v386_v45  ;;  %v445_v25 = vsel %vm441_vm9, %v846_v1, %v387_v42 }
 0x8f2   : > { %448 = vst [vmem:[%s142_s16] sm:$0xff] %v444_v24  ;;  %449 = vst [vmem:[%s142_s16 + $0x8] sm:$0xff] %v445_v25  ;;  %v439_v26 = vadd.s32 %v438_v22, %v436_v23 }
 0x8f4   : > { %vm442_vm10 = vcmp.eq.s32.totalorder %v856_v7, %v439_v26  ;;  %vm443_vm11 = vcmp.eq.s32.totalorder %v859_v8, %v439_v26 }
 0x8f5   : > { %v446_v27 = vsel %vm442_vm10, %v848_v2, %v388_v51  ;;  %v447_v28 = vsel %vm443_vm11, %v852_v4, %v389_v48 }
 0x8f6   : > { %450 = vst [vmem:[%s142_s16 + $0x10] sm:$0xff] %v446_v27  ;;  %451 = vst [vmem:[%s142_s16 + $0x18] sm:$0xff] %v447_v28 }
 0x8f7   : > { %s1029_s30 = smov (!%p462_p6, %s461_s30), 2 }
 0x8f8   : > { %s956_s2 = sshll.u32 %s1029_s30, 8 }
 0x8f9   : > { %s467_s4 = ssub.s32 512, %s956_s2 }
 0x8fa   : > { %468 = vsyncadd %s453_s23, %s467_s4  ;;  %p566_p10 = scmp.ne.s32.totalorder %s956_s2, 0  ;;  %s578_s5 = sshll.u32 %s755_s10, 9 }
 0x8fb   : > { %s966_s13 = scalar_lea.hbm %s1015_s1, %s578_s5  ;;  %s474_s14 = sshll.u32 %s142_s16, 4  ;;  %s968_s14 = int_to_ptr.vmem [resolvable:$true] %s474_s14 }
 0x8fc   : > { %s650_s19 = scalar_lea.vmem %s968_s14, %s956_s2  ;;  %s721_s20 = smov [#allocation5]  }
 0x8fd   : > { %p651_p9 = scmp.ne.s32.totalorder %s968_s14, %s650_s19  ;;  %s654_s21 = sshll.u32 %s721_s20, 4  ;;  %s655_s21 = int_to_ptr.vmem [resolvable:$false] %s654_s21 }
 0x8fe   : > { %s656_s10 = scalar_lea.vmem %s655_s21, 1024  ;;  %p657_p12 = scmp.lt.s32.totalorder %s968_s14, %s655_s21 }
 0x8ff   : > { %p652_p11 = pnand %p651_p9, %p566_p10  ;;  %p658_p0 = scmp.lt.s32.totalorder %s656_s10, %s650_s19 }
 0x901   : > { %p653_p13 = pneg %p652_p11  ;;  %p659_p1 = por %p658_p0, %p657_p12 }
 0x903   : > { %p660_p3 = pnand %p659_p1, %p653_p13 }
 0x905   : > { %663 = shalt.err (!%p660_p3)
}
 0x906   : > { %s664_s22 = scalar_lea.hbm %s966_s13, %s956_s2  ;;  %s668_s28 = scalar_lea.hbm %s1015_s1, 768 }
 0x907   : > { %p665_p4 = scmp.ne.s32.totalorder %s966_s13, %s664_s22  ;;  %p669_p7 = scmp.lt.u32.totalorder %s966_s13, %s1015_s1 }
 0x908   : > { %p670_p8 = scmp.lt.u32.totalorder %s668_s28, %s664_s22  ;;  %p672_p9 = scmp.lt.u32.totalorder %s664_s22, %s966_s13 }
 0x909   : > { %p666_p5 = pnand %p665_p4, %p566_p10 }
 0x90a   : > { %p671_p6 = por %p670_p8, %p669_p7 }
 0x90b   : > { %p667_p2 = pneg %p666_p5 }
 0x90c   : > { %p673_p11 = por %p672_p9, %p671_p6 }
 0x90e   : > { %p674_p13 = pnand %p673_p11, %p667_p2 }
 0x910   : > { %677 = shalt.err (!%p674_p13)
}
 0x911   : > { %s722_s16 = smov 256   ;;  %s723_s25 = smov 16  }
 0x912   : > { %480 = dma.vmem_to_hbm [thread:$0]  (%p566_p10), %s968_s14, %s956_s2, %s966_s13, %s453_s23, %s722_s16, %s722_s16, %s723_s25  }
 0x913 PF: > { %s489_s30 = sand.u32 1, %s704_s6   ;;  %p1020_p12 = scmp.ne.s32.totalorder %s1019_s18, 0 }
 0x914   : > { %p1021_p0 = scmp.ge.s32.totalorder %s716_s9, 2  ;;  %s490_s4 = scalar_lea.sflag [#allocation4], %s489_s30 }
 0x916   : > { %p582_p1 = pnand %p1021_p0, %p1020_p12 }
 0x918   : > { %699 = dma.done.wait (!%p582_p1), %s490_s4, 512  }
 0x919   : > { %701 = vsyncadd (!%p582_p1), %s490_s4, 4294966784  ;;  %p14_p3 = scmp.ge.s32.totalorder %s759_s12, 4   ;;  %s1022_s6 = smov %s708_s7 }
 0x91a   : > { %s1023_s7 = smov %s712_s8  ;;  %s1024_s8 = smov %s771_s15 }
 0x91b   : > { %s1025_s9 = smov %s759_s12  ;;  %16 = sbr.rel (!%p14_p3) target bundleno = 5 (0x5), region = 69 }
 0x922   :  { %495 = vsyncpa [#allocation3], 1 }
 0x923   :  { %497 = vsyncpa [#allocation3 + $0x1], 1 }
 0x924   :  { %498 = vsyncpa [#allocation4], 1 }
 0x925   :  { %500 = vsyncpa [#allocation4 + $0x1], 1 }

</bundles_post_ra>
